<compile_context>
chip_gen: v7x
topology: tpu7x:2x2x1
jax: 0.10.0
libtpu: 0.0.40
codegen_flags: <defaults>
</compile_context>

<pallas_src>
import functools

import jax
import jax.numpy as jnp
from jax.experimental import pallas as pl
from jax.experimental.pallas import tpu as pltpu


def _round_up(x, m):
    return ((x + m - 1) // m) * m


# ----------------------------------------------------------------------------
# Kernel
# ----------------------------------------------------------------------------
def ab_embeddings_kernel(ids_ref, table_ref, w_ref, b_ref, out_ref, *, eps):
    """One row-tile of the fused embedding + LayerNorm + UpEmbedding forward.

    ids_ref   : (TILE_N, 3) int32     -- [src_id, pid + V, pid2 + V + G]
    table_ref : (V + 2G, E) bf16      -- [aa; pos; pos2] concatenated
    w_ref     : (E, H2_pad)  bf16     -- gamma-folded, zero-padded UpEmbedding W
    b_ref     : (1, H2_pad)  f32      -- beta-folded, zero-padded bias
    out_ref   : (TILE_N, H2_pad)      -- bf16 (default) output tile
    """
    ids = ids_ref[...]                       # (n, 3) int32
    n = ids.shape[0]
    k_comb = table_ref.shape[0]

    # Fused one-hot gather: 3 ones per row (id ranges are disjoint), boolean OR
    # + single cast keeps this stage cheap on the VALU, then one MXU matmul.
    col = jax.lax.broadcasted_iota(jnp.int32, (n, k_comb), 1)
    oh = ((ids[:, 0:1] == col)
          | (ids[:, 1:2] == col)
          | (ids[:, 2:3] == col)).astype(jnp.bfloat16)

    emb = jnp.dot(oh, table_ref[...], preferred_element_type=jnp.float32)  # (n, E)

    # LayerNorm over the feature (lane) axis, f32.  gamma/beta are folded into
    # w_ref / b_ref by prepare_params, so no affine here.
    mean = jnp.mean(emb, axis=-1, keepdims=True)
    var = jnp.mean(jnp.square(emb - mean), axis=-1, keepdims=True)
    normed = (emb - mean) * jax.lax.rsqrt(var + eps)

    # UpEmbedding: Linear(E -> H2), bf16 operands, f32 accumulation.
    out = jnp.dot(normed.astype(jnp.bfloat16), w_ref[...],
                  preferred_element_type=jnp.float32)
    out_ref[...] = (out + b_ref[...]).astype(out_ref.dtype)


# ----------------------------------------------------------------------------
# Parameter preparation (done once, outside the per-call path)
# ----------------------------------------------------------------------------
def prepare_params(params):
    """Fuse the three tables, fold LayerNorm affine into the Linear, pad lanes."""
    aa, pos, pos2 = params["aa"], params["pos"], params["pos2"]
    gamma, beta = params["gamma"], params["beta"]
    w, b = params["w"], params["b"]

    E = aa.shape[1]
    H2 = w.shape[1]
    H2_pad = _round_up(H2, 128)              # lane-dense output width

    table = jnp.concatenate([aa, pos, pos2], axis=0).astype(jnp.bfloat16)

    # Fold LayerNorm affine into the Linear (in f32, cast only at the MXU
    # boundary):  (x*gamma + beta) @ w + b = x @ (gamma[:,None]*w) + (beta@w + b)
    w_fold = gamma.reshape(E, 1) * w                          # (E, H2) f32
    b_fold = beta.reshape(1, E) @ w + b                       # (1, H2) f32

    w_pad = jnp.pad(w_fold, ((0, 0), (0, H2_pad - H2))).astype(jnp.bfloat16)
    b_pad = jnp.pad(b_fold, ((0, 0), (0, H2_pad - H2))).astype(jnp.float32)

    return {"table": table, "w": w_pad, "b": b_pad,
            "num_aa": aa.shape[0], "gen_max_len": pos.shape[0],
            "h2": H2, "h2_pad": H2_pad}


# ----------------------------------------------------------------------------
# Forward wrapper
# ----------------------------------------------------------------------------
def ab_embeddings_forward(src, length, prepped, *, pad_token_id, eps,
                          tile_n=512, out_dtype=jnp.bfloat16):
    B, L = src.shape
    N = B * L

    table, w, b = prepped["table"], prepped["w"], prepped["b"]
    V, G = prepped["num_aa"], prepped["gen_max_len"]
    H2, H2_pad = prepped["h2"], prepped["h2_pad"]
    E = table.shape[1]
    K = table.shape[0]
    out_dtype = jnp.dtype(out_dtype)
    out_bytes = out_dtype.itemsize

    # create_position_ids_from_input_ids (integer glue, plain JAX).
    mask = (src != pad_token_id).astype(jnp.int32)
    pid = jnp.cumsum(mask, axis=1) * mask
    pid2 = (length[:, None].astype(jnp.int32) - pid + 2) * mask

    # Pack the three id streams into one (N, 3) int32 array; offsets select the
    # right slice of the fused [aa; pos; pos2] table.
    # NOTE: nn.Embedding would raise on out-of-range position ids; we clamp.
    ids = jnp.stack(
        [jnp.clip(src, 0, V - 1),
         jnp.clip(pid, 0, G - 1) + V,
         jnp.clip(pid2, 0, G - 1) + V + G],
        axis=-1).reshape(N, 3).astype(jnp.int32)

    # Row tile: aligned to the packed-sublane size of the output dtype (16 for
    # bf16, 8 for f32), sized so there are >= 2 grid blocks (both v7x
    # TensorCores get work), capped by tile_n and a conservative VMEM budget.
    row_align = 8 * max(1, 4 // out_bytes)
    tile = min(tile_n, max(row_align, _round_up(pl.cdiv(N, 2), row_align)))

    # VMEM re-budget (v7x has only 64 MiB physical / 32 MiB default scoped):
    # resident operands (double-buffered by default) + per-row output/ids
    # double buffers + per-row kernel temporaries.
    K_pad = _round_up(K, 128)
    E_pad = _round_up(E, 128)
    resident = 2 * (table.size * 2 + w.size * 2 + b.size * 4)
    per_row = (2 * H2_pad * out_bytes        # output double buffer
               + 2 * 128 * 4                 # ids double buffer (lane-padded)
               + K_pad * (4 + 2)             # iota i32 + bf16 one-hot temp
               + 2 * E_pad * 4               # emb / normed f32 temps
               + H2_pad * 4)                 # f32 accumulator before cast
    vmem_budget = 24 * (1 << 20)
    tile_cap = max(row_align,
                   ((vmem_budget - resident) // max(per_row, 1))
                   // row_align * row_align)
    tile = min(tile, tile_cap)

    n_blocks = pl.cdiv(N, tile)
    n_pad = n_blocks * tile
    if n_pad != N:
        # Pad rows with *valid* ids (aa[0], pos[0], pos2[0]); padded rows are
        # sliced off below but stay well-defined even if they weren't.
        pad_ids = jnp.broadcast_to(jnp.array([0, V, V + G], jnp.int32),
                                   (n_pad - N, 3))
        ids = jnp.concatenate([ids, pad_ids], axis=0)

    vmem_need = resident + tile * per_row
    vmem_limit = None
    if vmem_need > 30 * (1 << 20):
        vmem_limit = int(min(_round_up(vmem_need * 5 // 4, 1 << 20),
                             96 * (1 << 20)))

    cost = pl.CostEstimate(
        flops=2 * n_pad * E * (K + H2_pad),
        transcendentals=n_pad,                         # one rsqrt per row
        bytes_accessed=(ids.size * 4 + n_pad * H2_pad * out_bytes
                        + table.size * 2 + w.size * 2 + b.size * 4),
    )

    out = pl.pallas_call(
        functools.partial(ab_embeddings_kernel, eps=eps),
        out_shape=jax.ShapeDtypeStruct((n_pad, H2_pad), out_dtype),
        grid=(n_blocks,),
        in_specs=[
            pl.BlockSpec((tile, 3), lambda i: (i, 0)),       # ids: tiled rows
            pl.BlockSpec(table.shape, lambda i: (0, 0)),     # fused table (resident)
            pl.BlockSpec(w.shape, lambda i: (0, 0)),         # folded W (resident)
            pl.BlockSpec(b.shape, lambda i: (0, 0)),         # folded bias (resident)
        ],
        out_specs=pl.BlockSpec((tile, H2_pad), lambda i: (i, 0)),
        compiler_params=pltpu.CompilerParams(
            dimension_semantics=("parallel",),               # shard rows across TCs
            vmem_limit_bytes=vmem_limit),
        cost_estimate=cost,
    )(ids, table, w, b)

    # Slices are no-ops (and skipped) when tiling/lane padding is exact — the
    # intended production configuration (H2 % 128 == 0, tile | N).
    if n_pad != N:
        out = out[:N]
    if H2_pad != H2:
        out = out[:, :H2]
    return out.reshape(B, L, H2)


# ----------------------------------------------------------------------------
# Pure-JAX reference (unfused, f32) for validation
# ----------------------------------------------------------------------------
def ab_embeddings_reference(src, length, params, *, pad_token_id, eps):
    aa, pos, pos2 = params["aa"], params["pos"], params["pos2"]
    gamma, beta = params["gamma"], params["beta"]
    w, b = params["w"], params["b"]

    mask = (src != pad_token_id).astype(jnp.int32)
    pid = jnp.cumsum(mask, axis=1) * mask
    pid2 = (length[:, None].astype(jnp.int32) - pid + 2) * mask

    emb = aa[src] + pos[pid] + pos2[pid2]
    mean = jnp.mean(emb, axis=-1, keepdims=True)
    var = jnp.mean(jnp.square(emb - mean), axis=-1, keepdims=True)
    normed = (emb - mean) * jax.lax.rsqrt(var + eps) * gamma + beta
    return normed @ w + b


# ----------------------------------------------------------------------------
# Parameter init (matches the PyTorch module layout)
# ----------------------------------------------------------------------------
def init_params(key, *, num_tokens, small_embedding, gen_max_len, hidden_size,
                pad_token_id):
    ks = jax.random.split(key, 4)
    V = num_tokens + 1
    H2 = hidden_size * 2

    aa = 0.02 * jax.random.normal(ks[0], (V, small_embedding), jnp.float32)
    aa = aa.at[pad_token_id].set(0.0)          # padding_idx row is zero

    pos = 0.02 * jax.random.normal(ks[1], (gen_max_len, small_embedding), jnp.float32)
    pos = pos.at[0].set(0.0)                   # padding_idx=0 row is zero

    pos2 = 0.02 * jax.random.normal(ks[2], (gen_max_len, small_embedding), jnp.float32)
    pos2 = pos2.at[0].set(0.0)                 # padding_idx=0 row is zero

    gamma = jnp.ones((1, small_embedding), jnp.float32)
    beta = jnp.zeros((1, small_embedding), jnp.float32)

    w = 0.02 * jax.random.normal(ks[3], (small_embedding, H2), jnp.float32)
    b = jnp.zeros((1, H2), jnp.float32)

    return {"aa": aa, "pos": pos, "pos2": pos2,
            "gamma": gamma, "beta": beta, "w": w, "b": b}


if __name__ == "__main__":
    # args-like hyperparameters (small shapes, chosen so no output padding and
    # no row padding exist: H2 = 128 (lane-aligned), N = 32 -> two 16-row blocks).
    B, L = 2, 16
    num_tokens = 20
    pad_token_id = 0
    small_embedding = 32
    hidden_size = 64          # -> UpEmbedding output = 128 (lane-dense, no pad)
    gen_max_len = 32
    layer_norm_eps = 1e-12

    key = jax.random.PRNGKey(0)
    k_tok, k_params = jax.random.split(key, 2)

    params = init_params(k_params,
                         num_tokens=num_tokens,
                         small_embedding=small_embedding,
                         gen_max_len=gen_max_len,
                         hidden_size=hidden_size,
                         pad_token_id=pad_token_id)
    prepped = prepare_params(params)

    # Build src: valid tokens in [1, num_tokens] up to length[b], pad after.
    length = jnp.array([16, 10], dtype=jnp.int32)
    tok = jax.random.randint(k_tok, (B, L), 1, num_tokens + 1, dtype=jnp.int32)
    positions = jnp.arange(L, dtype=jnp.int32)[None, :]
    src = jnp.where(positions < length[:, None], tok, pad_token_id).astype(jnp.int32)

    out = ab_embeddings_forward(src, length, prepped,
                                pad_token_id=pad_token_id,
                                eps=layer_norm_eps)
    jax.block_until_ready(out)

    assert out.shape == (B, L, hidden_size * 2)
    assert out.dtype == jnp.bfloat16
    ref = ab_embeddings_reference(src, length, params,
                                  pad_token_id=pad_token_id, eps=layer_norm_eps)
    assert jnp.allclose(out.astype(jnp.float32), ref, atol=2e-2, rtol=2e-2), \
        "mismatch vs f32 reference"
    print("KERNEL_OK")
</pallas_src>

<mosaic_0001>
module attributes {stable_mosaic.version = 11 : i64} {
  func.func @ab_embeddings_kernel(%arg0: i32, %arg1: memref<16x3xi32, #tpu.memory_space<vmem>>, %arg2: memref<85x32xbf16, #tpu.memory_space<vmem>>, %arg3: memref<32x128xbf16, #tpu.memory_space<vmem>>, %arg4: memref<1x128xf32, #tpu.memory_space<vmem>>, %arg5: memref<16x128xbf16, #tpu.memory_space<vmem>>) attributes {dimension_semantics = [#tpu.dimension_semantics<parallel>], iteration_bounds = array<i64: 2>, scalar_prefetch = 0 : i64, scratch_operands = 0 : i64, tpu.core_type = #tpu.core_type<tc>, window_params = [{transform_indices = @transform_0, window_bounds = array<i64: 16, 3>}, {pipeline_mode = #tpu.pipeline_mode<synchronous>, transform_indices = @transform_1, window_bounds = array<i64: 85, 32>}, {pipeline_mode = #tpu.pipeline_mode<synchronous>, transform_indices = @transform_2, window_bounds = array<i64: 32, 128>}, {pipeline_mode = #tpu.pipeline_mode<synchronous>, transform_indices = @transform_3, window_bounds = array<i64: 1, 128>}, {transform_indices = @transform_4, window_bounds = array<i64: 16, 128>}]} {
    %c0 = arith.constant 0 : index
    %c0_0 = arith.constant 0 : index
    %0 = vector.load %arg1[%c0, %c0_0] : memref<16x3xi32, #tpu.memory_space<vmem>>, vector<16x3xi32>
    %1 = tpu.iota {dimensions = array<i32: 1>} : vector<16x85xi32>
    %2 = vector.extract_strided_slice %0 {offsets = [0, 0], sizes = [16, 1], strides = [1, 1]} : vector<16x3xi32> to vector<16x1xi32>
    %3 = vector.broadcast %2 : vector<16x1xi32> to vector<16x85xi32>
    %4 = arith.cmpi eq, %3, %1 : vector<16x85xi32>
    %5 = vector.extract_strided_slice %0 {offsets = [0, 1], sizes = [16, 1], strides = [1, 1]} : vector<16x3xi32> to vector<16x1xi32>
    %6 = vector.broadcast %5 : vector<16x1xi32> to vector<16x85xi32>
    %7 = arith.cmpi eq, %6, %1 : vector<16x85xi32>
    %8 = arith.ori %4, %7 : vector<16x85xi1>
    %9 = vector.extract_strided_slice %0 {offsets = [0, 2], sizes = [16, 1], strides = [1, 1]} : vector<16x3xi32> to vector<16x1xi32>
    %10 = vector.broadcast %9 : vector<16x1xi32> to vector<16x85xi32>
    %11 = arith.cmpi eq, %10, %1 : vector<16x85xi32>
    %12 = arith.ori %8, %11 : vector<16x85xi1>
    %13 = arith.extui %12 : vector<16x85xi1> to vector<16x85xi32>
    %14 = arith.sitofp %13 : vector<16x85xi32> to vector<16x85xf32>
    %15 = arith.truncf %14 : vector<16x85xf32> to vector<16x85xbf16>
    %c0_1 = arith.constant 0 : index
    %c0_2 = arith.constant 0 : index
    %16 = vector.load %arg2[%c0_1, %c0_2] : memref<85x32xbf16, #tpu.memory_space<vmem>>, vector<85x32xbf16>
    %cst = arith.constant dense<0.000000e+00> : vector<16x32xf32>
    %17 = tpu.matmul %15, %16, %cst {dimension_numbers = #tpu.dot_dimension_numbers<[1], [0], [0], [1], [0, 0, 1, 1], [], []>} : vector<16x85xbf16>, vector<85x32xbf16>, vector<16x32xf32> -> vector<16x32xf32>
    %cst_3 = arith.constant dense<0.000000e+00> : vector<16xf32>
    %18 = vector.multi_reduction <add>, %17, %cst_3 [1] : vector<16x32xf32> to vector<16xf32>
    %19 = vector.shape_cast %18 : vector<16xf32> to vector<16x1xf32>
    %cst_4 = arith.constant 3.200000e+01 : f32
    %20 = vector.broadcast %cst_4 : f32 to vector<16x1xf32>
    %21 = arith.divf %19, %20 : vector<16x1xf32>
    %22 = vector.broadcast %21 : vector<16x1xf32> to vector<16x32xf32>
    %23 = arith.subf %17, %22 : vector<16x32xf32>
    %24 = arith.mulf %23, %23 : vector<16x32xf32>
    %cst_5 = arith.constant dense<0.000000e+00> : vector<16xf32>
    %25 = vector.multi_reduction <add>, %24, %cst_5 [1] : vector<16x32xf32> to vector<16xf32>
    %26 = vector.shape_cast %25 : vector<16xf32> to vector<16x1xf32>
    %cst_6 = arith.constant 3.200000e+01 : f32
    %27 = vector.broadcast %cst_6 : f32 to vector<16x1xf32>
    %28 = arith.divf %26, %27 : vector<16x1xf32>
    %29 = vector.broadcast %21 : vector<16x1xf32> to vector<16x32xf32>
    %30 = arith.subf %17, %29 : vector<16x32xf32>
    %cst_7 = arith.constant 9.99999996E-13 : f32
    %31 = vector.broadcast %cst_7 : f32 to vector<16x1xf32>
    %32 = arith.addf %28, %31 : vector<16x1xf32>
    %33 = math.rsqrt %32 : vector<16x1xf32>
    %34 = vector.broadcast %33 : vector<16x1xf32> to vector<16x32xf32>
    %35 = arith.mulf %30, %34 : vector<16x32xf32>
    %36 = arith.truncf %35 : vector<16x32xf32> to vector<16x32xbf16>
    %c0_8 = arith.constant 0 : index
    %c0_9 = arith.constant 0 : index
    %37 = vector.load %arg3[%c0_8, %c0_9] : memref<32x128xbf16, #tpu.memory_space<vmem>>, vector<32x128xbf16>
    %cst_10 = arith.constant dense<0.000000e+00> : vector<16x128xf32>
    %38 = tpu.matmul %36, %37, %cst_10 {dimension_numbers = #tpu.dot_dimension_numbers<[1], [0], [0], [1], [0, 0, 1, 1], [], []>} : vector<16x32xbf16>, vector<32x128xbf16>, vector<16x128xf32> -> vector<16x128xf32>
    %c0_11 = arith.constant 0 : index
    %c0_12 = arith.constant 0 : index
    %39 = vector.load %arg4[%c0_11, %c0_12] : memref<1x128xf32, #tpu.memory_space<vmem>>, vector<1x128xf32>
    %40 = vector.broadcast %39 : vector<1x128xf32> to vector<16x128xf32>
    %41 = arith.addf %38, %40 : vector<16x128xf32>
    %42 = arith.truncf %41 : vector<16x128xf32> to vector<16x128xbf16>
    %c0_13 = arith.constant 0 : index
    %c0_14 = arith.constant 0 : index
    %43 = vector.load %arg5[%c0_13, %c0_14] : memref<16x128xbf16, #tpu.memory_space<vmem>>, vector<16x128xbf16>
    tpu.vector_store %arg5[%c0_13, %c0_14], %42 {strides = array<i32>} : memref<16x128xbf16, #tpu.memory_space<vmem>>, vector<16x128xbf16>,
    return
  }
  func.func @transform_0(%arg0: i32) -> (i32, i32) {
    %c0_i32 = arith.constant 0 : i32
    %c0_i32_0 = arith.constant 0 : i32
    return %arg0, %c0_i32 : i32, i32
  }
  func.func @transform_1(%arg0: i32) -> (i32, i32) {
    %c0_i32 = arith.constant 0 : i32
    %c0_i32_0 = arith.constant 0 : i32
    %c0_i32_1 = arith.constant 0 : i32
    return %c0_i32, %c0_i32_0 : i32, i32
  }
  func.func @transform_2(%arg0: i32) -> (i32, i32) {
    %c0_i32 = arith.constant 0 : i32
    %c0_i32_0 = arith.constant 0 : i32
    %c0_i32_1 = arith.constant 0 : i32
    return %c0_i32, %c0_i32_0 : i32, i32
  }
  func.func @transform_3(%arg0: i32) -> (i32, i32) {
    %c0_i32 = arith.constant 0 : i32
    %c0_i32_0 = arith.constant 0 : i32
    %c0_i32_1 = arith.constant 0 : i32
    return %c0_i32, %c0_i32_0 : i32, i32
  }
  func.func @transform_4(%arg0: i32) -> (i32, i32) {
    %c0_i32 = arith.constant 0 : i32
    %c0_i32_0 = arith.constant 0 : i32
    return %arg0, %c0_i32 : i32, i32
  }
}

</mosaic_0001>

<bundles_post_ra>
// kernel: tpu_custom_call.1
= control target key start
LH: loop header
LB: loop body
LE: loop exit
PB: predicated region body
PF: predicated region fallthrough
CT: control target
= control target key end

     0   :  { %9 = vsyncpa [#allocation3], 0  ;;  %s891_s0 = inlined_call_operand.vmem [shape: s32[32,3], index: 0, kind: input, shape index: {}]   ;;  %s892_s1 = inlined_call_operand.vmem [shape: bf16[85,32], index: 1, kind: input, shape index: {}]   ;;  %s893_s2 = inlined_call_operand.vmem [shape: bf16[32,128], index: 2, kind: input, shape index: {}]   ;;  %s894_s3 = inlined_call_operand.vmem [shape: f32[1,128], index: 3, kind: input, shape index: {}]   ;;  %s895_s4 = inlined_call_operand.hbm [shape: bf16[32,128], index: 4, kind: output, shape index: {}]  }
   0x1   :  { %11 = vsyncpa [#allocation3 + $0x1], 0  ;;  %s745_s15 = smov 0   ;;  %s747_s16 = smov 0  }
   0x2   :  { %s749_s17 = smov 0   ;;  %s751_s18 = smov 0  }
   0x3 LB: > { %s766_s19 = sadd.s32 4294967295, %s709_s18   ;;  %s515_s20 = sadd.s32 4294967294, %s709_s18   ;;  %s709_s18 = sphi %s751_s18, %s901_s18   ;;  %s705_s17 = sphi %s749_s17, %s900_s17   ;;  %s701_s16 = sphi %s747_s16, %s899_s16   ;;  %s697_s15 = sphi %s745_s15, %s898_s15  }
   0x4   : > { %s770_s21 = sadd.s32 1, %s709_s18   ;;  %s113_s22 = sadd.s32 1, %s705_s17 }
   0x5   : > { %s110_s23 = ssub.s32 %s709_s18, %s770_s21  ;;  %p123_p0 = scmp.ne.s32.totalorder %s705_s17, %s701_s16 }
   0x6   : > { %p111_p1 = scmp.eq.s32.totalorder %s110_s23, 0  ;;  %p124_p2 = scmp.eq.s32.totalorder %s766_s19, 1 }
   0x7   : > { %p129_p3 = scmp.ne.s32.totalorder %s701_s16, %s697_s15  ;;  %p130_p4 = scmp.eq.s32.totalorder %s515_s20, 1 }
   0x8   : > { %s781_s24 = scalar_select %p111_p1, %s705_s17, %s113_s22  }
   0x9   : > { %p783_p5 = por %p124_p2, %p123_p0  ;;  %p787_p6 = por %p130_p4, %p129_p3 }
   0xa   : > { %p518_p7 = scmp.ge.s32.totalorder %s709_s18, 1  ;;  %p166_p8 = scmp.lt.s32.totalorder %s709_s18, 3 }
   0xc   : > { %p167_p9 = pnand %p518_p7, %p166_p8 }
   0xd   : > { %s520_s27 = sshll.u32 (!%p167_p9), %s766_s19, 1  ;;  %v635_v0 = vld [vmem:[%s892_s1] sm:$0xff] (!%p167_p9)   ;;  %v711_v1 = vmov (!%p167_p9), 1   ;;  %v712_v2 = vmov (!%p167_p9), 0   ;;  %v713_v3 = vmov (!%p167_p9), 0.0   ;;  %v636_v4 = vld [vmem:[%s892_s1 + $0x8] sm:$0xff] (!%p167_p9)   ;;  %v202_v16 = vlaneseq (!%p167_p9) }
   0xe   : > { %170 = sbr.rel (%p167_p9) target bundleno = 926 (0x39e), region = 36  ;;  %632 = vset.pattern.permute.xlu1 (!%p167_p9), %v711_v1  ;;  %631 = vset.pattern.permute.xlu0 (!%p167_p9), %v712_v2  ;;  %p193_p10 = scmp.lt.s32.totalorder (!%p167_p9), %s520_s27, 3  ;;  %v637_v6 = vld [vmem:[%s892_s1 + $0x10] sm:$0xff] (!%p167_p9)   ;;  %v638_v8 = vld [vmem:[%s892_s1 + $0x18] sm:$0xff] (!%p167_p9)   ;;  %v639_v9 = vld [vmem:[%s892_s1 + $0x20] sm:$0xff] (!%p167_p9)   ;;  %vm285_vm0 = vcmask (!%p167_p9), 1041408  }
   0xf   : > { %560 = vmatprep.subr.bf16.mxu0 (!%p167_p9), %v713_v3  ;;  %576 = vmatprep.subr.bf16.mxu1 (!%p167_p9), %v713_v3  ;;  %v714_v10 = vmov (!%p167_p9), 2   ;;  %v640_v11 = vld [vmem:[%s892_s1 + $0x28] ss:$0 sps:$4 sm:$0x77] (!%p167_p9)   ;;  %vm286_vm1 = vcmask (!%p167_p9), 1042432   ;;  %v715_v12 = vmov (!%p167_p9), 65535  }
  0x10   : > { %561 = vmatpush3.bf16.msra.mxu0 (!%p167_p9), %v635_v0  ;;  %v287_v13 = vsel (!%p167_p9), %vm285_vm0, 4294967295, %v715_v12  ;;  %vm716_vm2 = vmmov (!%p167_p9), 0   ;;  %v203_v19 = vand.u32 (!%p167_p9), 127, %v202_v16  ;;  %vm281_vm13 = vcmask (!%p167_p9), 695296   ;;  %v641_v43 = vld [vmem:[%s893_s2] sm:$0xff] (!%p167_p9)   ;;  %v642_v44 = vld [vmem:[%s893_s2 + $0x8] sm:$0xff] (!%p167_p9)  }
  0x11   : > { %562 = vmatprep.subr.bf16.mxu0 (!%p167_p9), %v713_v3  ;;  %v288_v14 = vsel (!%p167_p9), %vm286_vm1, %v287_v13, 0  ;;  %572 = vmatprep.mubr.msk.bf16.mxu0 (!%p167_p9), %vm716_vm2, %v713_v3  ;;  %vm333_vm14 = vcmask (!%p167_p9), 261120   ;;  %s189_s5 = sand.u32 (!%p167_p9), 1, %s701_s16   ;;  %v531_v56 = vld [vmem:[%s894_s3] ss:$0 sm:$0xff] (!%p167_p9)  ;;  %s544_s11 = sshll.u32 (!%p167_p9), %s766_s19, 7 }
  0x12   : > { %v290_v15 = vand.u32 (!%p167_p9), %v640_v11, %v288_v14  ;;  %580 = vmatprep.mubr.msk.bf16.mxu1 (!%p167_p9), %vm716_vm2, %v713_v3  ;;  %577 = vmatpush3.bf16.msra.mxu1 (!%p167_p9), %v641_v43  ;;  %s848_s14 = scalar_lea.hbm (!%p167_p9), %s895_s4, %s544_s11  ;;  %s850_s20 = scalar_lea.sflag (!%p167_p9), [#allocation3], %s189_s5 }
  0x13   : > { %578 = vmatprep.subr.bf16.mxu1 (!%p167_p9), %v713_v3  ;;  %s717_s19 = smov (!%p167_p9), [#allocation2]  }
  0x14   : > { %563 = vmatpush3.bf16.msra.mxu0 (!%p167_p9), %v636_v4  ;;  %s651_s23 = sshll.u32 (!%p167_p9), %s717_s19, 4  ;;  %s652_s23 = int_to_ptr.vmem [resolvable:$false] %s651_s23 }
  0x15   : > { %s903_s27 = smov (!%p193_p10, %s520_s27), 3  ;;  %564 = vmatprep.subr.bf16.mxu0 %v713_v3 }
  0x16   : > { %s521_s6 = sshll.u32 %s903_s27, 3  ;;  %579 = vmatpush3.bf16.msra.mxu1 %v642_v44  ;;  %s653_s27 = scalar_lea.vmem %s652_s23, 256 }
  0x17   : > { %s196_s9 = scalar_lea.vmem %s891_s0, %s521_s6  ;;  %s519_s6 = sshll.u32 %s189_s5, 3 }
  0x18   : > { %v200_v5 = vld [vmem:[%s196_s9] sm:$0xff]  ;;  %v201_v7 = vld [vmem:[%s196_s9 + $0x8] sm:$0xff]  ;;  %565 = vmatpush3.bf16.msra.mxu0 %v637_v6  ;;  %s191_s9 = scalar_lea.vmem [#allocation2], %s519_s6 }
  0x19   : > { %213 = vperm.xlu1 %632, %v200_v5   ;;  %205 = vperm.xlu0 %631, %v200_v5   ;;  %s453_s10 = sshll.u32 %s191_s9, 4  ;;  %s843_s10 = int_to_ptr.vmem [resolvable:$true] %s453_s10 }
  0x1a   : > { %566 = vmatprep.subr.bf16.mxu0 %v713_v3  ;;  %s647_s22 = scalar_lea.vmem %s843_s10, 128  ;;  %p654_p0 = scmp.lt.s32.totalorder %s843_s10, %s652_s23 }
  0x1b   : > { %p648_p11 = scmp.ne.s32.totalorder %s843_s10, %s647_s22  ;;  %p655_p1 = scmp.lt.s32.totalorder %s653_s27, %s647_s22 }
  0x1c   : > { %567 = vmatpush3.bf16.msra.mxu0 %v638_v8 }
  0x1d   : > { %216 = vperm.xlu1 %632, %v201_v7   ;;  %208 = vperm.xlu0 %631, %v201_v7   ;;  %p649_p12 = pnand %p648_p11, %p783_p5  ;;  %p656_p2 = por %p655_p1, %p654_p0 }
  0x1e   : > { %568 = vmatprep.subr.bf16.mxu0 %v713_v3 }
  0x1f   : > { %p650_p13 = pneg %p649_p12 }
  0x20   : > { %569 = vmatpush3.bf16.msra.mxu0 %v639_v9 }
  0x21   : > { %634 = vset.pattern.permute.xlu1 %v714_v10  ;;  %633 = vset.pattern.permute.xlu0 %v714_v10  ;;  %p657_p3 = pnand %p656_p2, %p650_p13 }
  0x22   : > { %226 = vperm.xlu1 %634, %v201_v7   ;;  %223 = vperm.xlu0 %633, %v200_v5  }
  0x23   : > { %570 = vmatprep.subr.bf16.mxu0 %v713_v3 }
  0x24   : > { %571 = vmatpush3.bf16.msra.mxu0 %v290_v15 }
  0x98   : > { %v214_v17 = vpop.permute.xlu1 %213  ;;  %v206_v18 = vpop.permute.xlu0 %205 }
  0x99   : > { %vm218_vm3 = vcmp.eq.s32.totalorder %v214_v17, %v203_v19  ;;  %vm210_vm4 = vcmp.eq.s32.totalorder %v206_v18, %v203_v19 }
  0x9a   : > { %vm220_vm7 = vmor %vm210_vm4, %vm218_vm3 }
  0x9c   : > { %v217_v20 = vpop.permute.xlu1 %216  ;;  %v209_v21 = vpop.permute.xlu0 %208 }
  0x9d   : > { %vm219_vm5 = vcmp.eq.s32.totalorder %v217_v20, %v203_v19  ;;  %vm211_vm6 = vcmp.eq.s32.totalorder %v209_v21, %v203_v19 }
  0x9e   : > { %vm221_vm8 = vmor %vm211_vm6, %vm219_vm5 }
  0xa1   : > { %v227_v22 = vpop.permute.xlu1 %226  ;;  %v224_v23 = vpop.permute.xlu0 %223 }
  0xa2   : > { %vm229_vm9 = vcmp.eq.s32.totalorder %v227_v22, %v203_v19  ;;  %vm228_vm10 = vcmp.eq.s32.totalorder %v224_v23, %v203_v19 }
  0xa3   : > { %vm231_vm11 = vmor %vm221_vm8, %vm229_vm9 }
  0xa4   : > { %v523_v24 = vsel %vm231_vm11, 1.0, %v713_v3  ;;  %vm230_vm12 = vmor %vm220_vm7, %vm228_vm10 }
  0xa5   : > { %v522_v25 = vsel %vm230_vm12, 1.0, %v713_v3 }
  0xa6   : > { %v236_v26 = vpack.c.bf16 %v523_v24, %v522_v25 }
  0xa8   : > { %573 = vmatmul.mubr.msk.bf16.vlgmr.msra.gmra.mrb[0].mxu0 %vm281_vm13, %v236_v26 }
 0x17b   : > { %v326_v27 = vpop.f32.mrb[0].mxu0 }
 0x17c   : > { %v574_v28 = vpop.f32.mrb[1].mxu0  ;;  %v334_v29 = vsel %vm333_vm14, %v326_v27, 0.0 }
 0x17d   : > { %335 = vadd.xlane.f32.xlu1 %v334_v29  ;;  %v329_v30 = vpop.f32.mrb[2].mxu0 }
 0x17e   : > { %v575_v31 = vpop.f32.mrb[3].mxu0  ;;  %v337_v32 = vsel %vm333_vm14, %v329_v30, 0.0 }
 0x17f   : > { %338 = vadd.xlane.f32.xlu0 %v337_v32 }
 0x20a   : > { %v336_v33 = vpop.xlane.xlu1 %335 }
 0x20b   : > { %v341_v34 = vmul.f32 0.03125, %v336_v33 }
 0x20c   : > { %v339_v35 = vpop.xlane.xlu0 %338 }
 0x20d   : > { %v343_v36 = vsub.f32 %v326_v27, %v341_v34  ;;  %v342_v37 = vmul.f32 0.03125, %v339_v35 }
 0x20f   : > { %v344_v38 = vsub.f32 %v329_v30, %v342_v37  ;;  %v345_v39 = vmul.f32 %v343_v36, %v343_v36 }
 0x211   : > { %v347_v40 = vsel %vm333_vm14, %v345_v39, 0.0  ;;  %v346_v41 = vmul.f32 %v344_v38, %v344_v38 }
 0x212   : > { %348 = vadd.xlane.f32.xlu0 %v347_v40 }
 0x213   : > { %v350_v42 = vsel %vm333_vm14, %v346_v41, 0.0 }
 0x214   : > { %351 = vadd.xlane.f32.xlu1 %v350_v42 }
 0x29f   : > { %v349_v45 = vpop.xlane.xlu0 %348 }
 0x2a0   : > { %v353_v46 = vmul.f32 0.03125, %v349_v45 }
 0x2a1   : > { %v352_v47 = vpop.xlane.xlu1 %351 }
 0x2a2   : > { %v355_v48 = vadd.f32 1e-12, %v353_v46  ;;  %v354_v49 = vmul.f32 0.03125, %v352_v47 }
 0x2a4   : > { %643 = vrsqrt.f32 %v355_v48  ;;  %v356_v50 = vadd.f32 1e-12, %v354_v49 }
 0x2a6   : > { %645 = vrsqrt.f32 %v356_v50 }
 0x2ae   : > { %v644_v51 = vpop.eup %643 }
 0x2af   : > { %v359_v53 = vmul.f32 %v644_v51, %v343_v36 }
 0x2b0   : > { %v646_v52 = vpop.eup %645 }
 0x2b1   : > { %v360_v54 = vmul.f32 %v646_v52, %v344_v38 }
 0x2b3   : > { %v361_v55 = vpack.c.bf16 %v360_v54, %v359_v53 }
 0x2b5   : > { %581 = vmatmul.mubr.msk.bf16.vlgmr.msra.gmra.mrb[0].mxu1 %vm333_vm14, %v361_v55 }
 0x388   : > { %v422_v57 = vpop.f32.mrb[0].mxu1 }
 0x389   : > { %v582_v58 = vpop.f32.mrb[1].mxu1  ;;  %v423_v60 = vadd.f32 %v531_v56, %v422_v57 }
 0x38a   : > { %v425_v59 = vpop.f32.mrb[2].mxu1 }
 0x38b   : > { %v426_v61 = vadd.f32 %v531_v56, %v425_v59  ;;  %v583_v62 = vpop.f32.mrb[3].mxu1 }
 0x38d   : > { %v548_v63 = vpack.c.bf16 %v426_v61, %v423_v60 }
 0x38f   : > { %549 = vst [vmem:[%s191_s9] sm:$0xff] %v548_v63  }
 0x390   : > { %660 = shalt.err (!%p657_p3)
}
 0x391   : > { %s661_s28 = scalar_lea.hbm %s848_s14, 128  ;;  %s665_s5 = scalar_lea.hbm %s895_s4, 256 }
 0x392   : > { %p662_p4 = scmp.ne.s32.totalorder %s848_s14, %s661_s28  ;;  %p666_p9 = scmp.lt.u32.totalorder %s848_s14, %s895_s4 }
 0x393   : > { %p667_p10 = scmp.lt.u32.totalorder %s665_s5, %s661_s28  ;;  %p669_p12 = scmp.lt.u32.totalorder %s661_s28, %s848_s14 }
 0x394   : > { %p663_p7 = pnand %p662_p4, %p783_p5 }
 0x395   : > { %p668_p11 = por %p667_p10, %p666_p9 }
 0x396   : > { %p664_p8 = pneg %p663_p7 }
 0x397   : > { %p670_p13 = por %p669_p12, %p668_p11 }
 0x399   : > { %p671_p0 = pnand %p670_p13, %p664_p8 }
 0x39b   : > { %674 = shalt.err (!%p671_p0)
}
 0x39c   : > { %s718_s8 = smov 64   ;;  %s719_s9 = smov 4  }
 0x39d   : > { %584 = dma.vmem_to_hbm [thread:$0]  (%p783_p5), %s843_s10, 128, %s848_s14, %s850_s20, %s718_s8, %s718_s8, %s719_s9  }
 0x39e PF: > { %p590_p1 = scmp.ge.s32.totalorder %s709_s18, 2  ;;  %s468_s11 = sand.u32 1, %s697_s15  }
 0x39f   : > { %s469_s12 = scalar_lea.sflag [#allocation3], %s468_s11 }
 0x3a0   : > { %p587_p2 = pnand %p590_p1, %p787_p6 }
 0x3a2   : > { %692 = dma.done.wait (!%p587_p2), %s469_s12, 128  }
 0x3a3   : > { %694 = vsyncadd (!%p587_p2), %s469_s12, 4294967168  ;;  %p14_p3 = scmp.ge.s32.totalorder %s770_s21, 4   ;;  %s898_s15 = smov %s701_s16 }
 0x3a4   : > { %s899_s16 = smov %s705_s17  ;;  %s900_s17 = smov %s781_s24 }
 0x3a5   : > { %s901_s18 = smov %s770_s21  ;;  %16 = sbr.rel (!%p14_p3) target bundleno = 3 (0x3), region = 71 }
 0x3ac   :  { %474 = vsyncpa [#allocation3], 1 }
 0x3ad   :  { %476 = vsyncpa [#allocation3 + $0x1], 1 }

</bundles_post_ra>
